<compile_context>
chip_gen: v5e
topology: v5e:2x2
jax: 0.10.0
libtpu: 0.0.40
codegen_flags: <defaults>
</compile_context>

<pallas_src>
import functools

import jax
import jax.numpy as jnp
from jax.experimental import pallas as pl
from jax.experimental.pallas import tpu as pltpu


# ----------------------------------------------------------------------------
# Parameter ("buffer") construction — plain JAX glue, deterministic.
# ----------------------------------------------------------------------------
def make_positional_encoding(embedding_dim: int, max_len: int = 5000,
                             dtype=jnp.float32):
    position = jnp.arange(0, max_len, dtype=jnp.float32)[:, None]             # [L,1]
    div_term = jnp.exp(
        jnp.arange(0, embedding_dim, 2, dtype=jnp.float32)
        * (-jnp.log(jnp.float32(10000.0)) / embedding_dim))                   # [E/2]
    angles = position * div_term                                               # [L,E/2]
    pe = jnp.zeros((max_len, 1, embedding_dim), dtype=dtype)
    pe = pe.at[:, 0, 0::2].set(jnp.sin(angles).astype(dtype))
    pe = pe.at[:, 0, 1::2].set(jnp.cos(angles).astype(dtype))
    return pe


# ----------------------------------------------------------------------------
# In-kernel helpers.
# ----------------------------------------------------------------------------
def _tile_lanes(v, reps: int):
    """Repeat v `reps` times along the lane axis via O(log reps) concats."""
    if reps == 1:
        return v
    pieces = []
    bit = v
    r = reps
    while r:
        if r & 1:
            pieces.append(bit)
        r >>= 1
        if r:
            bit = jnp.concatenate([bit, bit], axis=-1)
    return pieces[0] if len(pieces) == 1 else jnp.concatenate(pieces, axis=-1)


def _hash_u32(v):
    # "lowbias32" integer mixer — 2 uint32 multiplies, good avalanche.
    v = v ^ (v >> 16)
    v = v * jnp.uint32(0x7FEB352D)
    v = v ^ (v >> 15)
    v = v * jnp.uint32(0x846CA68B)
    v = v ^ (v >> 16)
    return v


# ----------------------------------------------------------------------------
# Pallas kernels.
# ----------------------------------------------------------------------------
def _pe_add_kernel(x_ref, pe_ref, o_ref, *, n_rep):
    # x_ref/o_ref: (ts, lane_tile); pe_ref: (ts, E); lane_tile == n_rep * E.
    pe_b = _tile_lanes(pe_ref[...].astype(x_ref.dtype), n_rep)
    o_ref[...] = x_ref[...] + pe_b          # single full-width add + store


def _pe_add_dropout_kernel(seed_ref, x_ref, pe_ref, o_ref, *, rate, n_rep,
                           lane_tile):
    # Training-mode inverted dropout.  Mask is a pure function of
    # (seed, global element index of the [S, B*E] slab == flattened [S,B,E]),
    # so it is invariant to the tiling and to megacore sharding.
    ts, tl = x_ref.shape
    i = pl.program_id(0)                     # sequence-tile index
    j = pl.program_id(1)                     # lane-tile index

    thresh = jnp.uint32(min(int(rate * 4294967296.0), 4294967295))
    scale = jnp.array(1.0 / (1.0 - rate), dtype=x_ref.dtype)

    pe_b = _tile_lanes(pe_ref[...].astype(x_ref.dtype), n_rep)
    y = x_ref[...] + pe_b

    seed_u = seed_ref[0].astype(jnp.uint32)
    seed_mix = seed_u * jnp.uint32(0x9E3779B1) + jnp.uint32(0x85EBCA6B)

    # Row term hashed ONCE per row (hoisted): only one lowbias32 pass
    # (2 uint32 multiplies) remains per element.
    rows = jax.lax.broadcasted_iota(jnp.int32, (ts, 1), 0).astype(jnp.uint32)
    grow = rows + (i * ts).astype(jnp.uint32)                 # global seq row
    rh = _hash_u32(grow ^ seed_mix)                            # (ts, 1)

    cols = jax.lax.broadcasted_iota(jnp.int32, (ts, tl), 1).astype(jnp.uint32)
    gcol = cols + (j * lane_tile).astype(jnp.uint32)           # global lane col
    r = _hash_u32(rh ^ gcol)                                   # (ts, tl)

    keep = r >= thresh
    o_ref[...] = jnp.where(keep, y * scale, jnp.zeros((), dtype=y.dtype))
    # TODO(synk): optionally switch to pltpu.prng_random_bits to offload bit
    # generation from the VALU when a tile-invariant mask is not required.


# ----------------------------------------------------------------------------
# Tiling heuristics.
# ----------------------------------------------------------------------------
def _target_block_bytes():
    # Generation-aware block size: bigger blocks on v7x (3.2 TB/s HBM amortizes
    # the ~0.35us per-grid-step overhead), smaller on v5e (16 MiB scoped VMEM).
    try:
        kind = jax.devices()[0].device_kind.lower()
    except Exception:
        return 2 * 1024 * 1024
    if "v7" in kind:
        return 5 * 1024 * 1024
    if "v6" in kind:
        return 3 * 1024 * 1024
    return 2 * 1024 * 1024


def _pick_tiles(seq_len, n_batch, emb, itemsize, sublane, target_bytes):
    be = n_batch * emb
    lane_tile = be
    # Guard (hits v7x first): if even a minimum-height block exceeds the
    # target, split the lane axis in multiples of E (lane tile stays a
    # multiple of 128 when E is, and the pe index_map stays modulo-free).
    if be * itemsize * sublane > target_bytes and emb % 128 == 0 and n_batch > 1:
        nb = max(1, target_bytes // (sublane * emb * itemsize))
        nb = min(nb, n_batch)
        lane_tile = nb * emb
    n_lane = pl.cdiv(be, lane_tile)

    row_bytes = lane_tile * itemsize
    ts = max(1, target_bytes // max(1, row_bytes))
    ts = min(seq_len, int(ts))
    if ts < seq_len:
        ts = max(sublane, (ts // sublane) * sublane)   # dtype-aware sublane tile
    n_seq = pl.cdiv(seq_len, ts)
    return ts, lane_tile, n_seq, n_lane


# ----------------------------------------------------------------------------
# Wrapper.
# ----------------------------------------------------------------------------
def positional_encoding_forward(x, pe, *, dropout_rate: float = 0.1,
                                training: bool = False, seed: int = 0):
    S, B, E = x.shape
    max_len = pe.shape[0]
    assert S <= max_len

    # Lane-dense views: [S, B, E] -> [S, B*E], [max_len, 1, E] -> [max_len, E].
    # Contiguous minor-dim merges -> no data movement.
    x2 = x.reshape(S, B * E)
    pe2 = pe.reshape(max_len, E)

    itemsize = x.dtype.itemsize
    sublane = max(8, 32 // itemsize)                 # 8 f32 / 16 bf16 / 32 int8
    ts, lane_tile, n_seq, n_lane = _pick_tiles(S, B, E, itemsize, sublane,
                                               _target_block_bytes())
    n_rep = lane_tile // E

    if ts % 8 != 0:
        # Tiny/odd S: make the pe block's sublane dim its full extent so the
        # (8,128) tiling rule is still satisfied.
        pe2 = pe2[:S]

    grid = (n_seq, n_lane)
    compiler_params = pltpu.CompilerParams(
        dimension_semantics=("parallel", "parallel"))
    out_shape = jax.ShapeDtypeStruct((S, B * E), x.dtype)

    if (not training) or dropout_rate <= 0.0:
        # Eval mode: dropout is the identity (nn.Dropout in eval).
        kern = functools.partial(_pe_add_kernel, n_rep=n_rep)
        y2 = pl.pallas_call(
            kern,
            out_shape=out_shape,
            grid_spec=pltpu.PrefetchScalarGridSpec(
                num_scalar_prefetch=0,
                grid=grid,
                in_specs=[
                    pl.BlockSpec((ts, lane_tile), lambda i, j: (i, j)),
                    pl.BlockSpec((ts, E), lambda i, j: (i, 0)),
                ],
                out_specs=pl.BlockSpec((ts, lane_tile), lambda i, j: (i, j)),
            ),
            compiler_params=compiler_params,
            input_output_aliases={0: 0},   # x2 -> y2 (free buffer reuse)
        )(x2, pe2)
    else:
        if dropout_rate >= 1.0:
            raise ValueError("dropout_rate must be < 1.0 in training mode")
        kern = functools.partial(_pe_add_dropout_kernel,
                                 rate=float(dropout_rate), n_rep=n_rep,
                                 lane_tile=lane_tile)
        seed_arr = jnp.array([seed], dtype=jnp.int32)
        y2 = pl.pallas_call(
            kern,
            out_shape=out_shape,
            grid_spec=pltpu.PrefetchScalarGridSpec(
                num_scalar_prefetch=1,
                grid=grid,
                in_specs=[
                    pl.BlockSpec((ts, lane_tile), lambda i, j, s: (i, j)),
                    pl.BlockSpec((ts, E), lambda i, j, s: (i, 0)),
                ],
                out_specs=pl.BlockSpec((ts, lane_tile), lambda i, j, s: (i, j)),
            ),
            compiler_params=compiler_params,
        )(seed_arr, x2, pe2)

    return y2.reshape(S, B, E)


# ----------------------------------------------------------------------------
# Main.
# ----------------------------------------------------------------------------
if __name__ == "__main__":
    SEQ, BATCH, EMB = 8, 2, 32
    MAX_LEN = 64  # small max_len for the synthetic test (module default 5000)

    key = jax.random.PRNGKey(0)
    x = jax.random.normal(key, (SEQ, BATCH, EMB), dtype=jnp.float32)
    pe = make_positional_encoding(EMB, max_len=MAX_LEN, dtype=jnp.float32)

    # Eval-mode forward (dropout == identity): exact check vs reference.
    out = positional_encoding_forward(x, pe, dropout_rate=0.1, training=False)
    out = jax.block_until_ready(out)
    ref = x + pe[:SEQ]
    assert out.shape == (SEQ, BATCH, EMB)
    assert jnp.allclose(out, ref, atol=1e-6, rtol=1e-6), "mismatch vs reference"

    # Training-mode forward: every surviving element must equal
    # (x + pe) / (1 - p); dropped elements are exactly 0.
    rate = 0.1
    out_tr = positional_encoding_forward(x, pe, dropout_rate=rate,
                                         training=True, seed=0)
    out_tr = jax.block_until_ready(out_tr)
    assert out_tr.shape == (SEQ, BATCH, EMB)
    assert bool(jnp.all(jnp.isfinite(out_tr)))

    scaled = ref / (1.0 - rate)
    dropped = out_tr == 0
    ok = jnp.where(dropped, True,
                   jnp.isclose(out_tr, scaled, atol=1e-5, rtol=1e-5))
    assert bool(jnp.all(ok)), "kept elements must match (x+pe)/(1-p)"
    n_drop = int(jnp.sum(dropped))
    assert 0 < n_drop < dropped.size, "dropout mask degenerate"

    print("KERNEL_OK")
</pallas_src>

<mosaic_0001>
module attributes {stable_mosaic.version = 11 : i64} {
  func.func @_pe_add_kernel(%arg0: i32, %arg1: i32, %arg2: memref<8x64xf32, #tpu.memory_space<vmem>>, %arg3: memref<8x32xf32, #tpu.memory_space<vmem>>, %arg4: memref<8x64xf32, #tpu.memory_space<vmem>>) attributes {dimension_semantics = [#tpu.dimension_semantics<parallel>, #tpu.dimension_semantics<parallel>], iteration_bounds = array<i64: 1, 1>, scalar_prefetch = 0 : i64, scratch_operands = 0 : i64, tpu.core_type = #tpu.core_type<tc>, window_params = [{transform_indices = @transform_0, window_bounds = array<i64: 8, 64>}, {transform_indices = @transform_1, window_bounds = array<i64: 8, 32>}, {transform_indices = @transform_2, window_bounds = array<i64: 8, 64>}]} {
    %c0 = arith.constant 0 : index
    %c0_0 = arith.constant 0 : index
    %0 = vector.load %arg3[%c0, %c0_0] : memref<8x32xf32, #tpu.memory_space<vmem>>, vector<8x32xf32>
    %1 = tpu.concatenate %0, %0 in 1 : vector<8x32xf32>, vector<8x32xf32> -> vector<8x64xf32>
    %c0_1 = arith.constant 0 : index
    %c0_2 = arith.constant 0 : index
    %2 = vector.load %arg2[%c0_1, %c0_2] : memref<8x64xf32, #tpu.memory_space<vmem>>, vector<8x64xf32>
    %3 = arith.addf %2, %1 : vector<8x64xf32>
    %c0_3 = arith.constant 0 : index
    %c0_4 = arith.constant 0 : index
    %4 = vector.load %arg4[%c0_3, %c0_4] : memref<8x64xf32, #tpu.memory_space<vmem>>, vector<8x64xf32>
    tpu.vector_store %arg4[%c0_3, %c0_4], %3 {strides = array<i32>} : memref<8x64xf32, #tpu.memory_space<vmem>>, vector<8x64xf32>,
    return
  }
  func.func @transform_0(%arg0: i32, %arg1: i32) -> (i32, i32) {
    %c0_i32 = arith.constant 0 : i32
    return %arg0, %arg1 : i32, i32
  }
  func.func @transform_1(%arg0: i32, %arg1: i32) -> (i32, i32) {
    %c0_i32 = arith.constant 0 : i32
    %c0_i32_0 = arith.constant 0 : i32
    return %arg0, %c0_i32 : i32, i32
  }
  func.func @transform_2(%arg0: i32, %arg1: i32) -> (i32, i32) {
    %c0_i32 = arith.constant 0 : i32
    return %arg0, %arg1 : i32, i32
  }
}

</mosaic_0001>

<bundles_post_ra>
// kernel: tpu_custom_call.1
= control target key start
LH: loop header
LB: loop body
LE: loop exit
PB: predicated region body
PF: predicated region fallthrough
CT: control target
= control target key end

     0   :  { %7 = vsyncpa [#allocation3], 0  ;;  %s136_s0 = inlined_call_operand.hbm [shape: f32[8,64], index: 0, kind: input, shape index: {}, may-alias: {0,2}]   ;;  %s137_s1 = inlined_call_operand.vmem [shape: f32[64,32], index: 1, kind: input, shape index: {}]   ;;  %s138_s2 = inlined_call_operand.hbm [shape: f32[8,64], index: 2, kind: output, shape index: {}, may-alias: {0,2}]  }
   0x1   :  { %8 = vsyncpa [#allocation4], 0  ;;  %s14_s11 = sshll.u32 %s136_s0, 4  ;;  %s109_s12 = smov [#allocation2]   ;;  %s15_s11 = int_to_ptr.hbm [resolvable:$true] %s14_s11 }
   0x2   :  { %s16_s13 = sshll.u32 %s109_s12, 4  ;;  %s17_s13 = int_to_ptr.vmem [resolvable:$true] %s16_s13 }
   0x3   :  { %19 = dma.hbm_to_vmem [thread:$0]  %s15_s11, 128, %s17_s13, [#allocation3]  }
   0x4   :  { %105 = dma.done.wait [#allocation3], 128  }
   0x5   :  { %106 = vsyncadd [#allocation3], 4294967168  ;;  %v26_v0 = vld [vmem:[%s137_s1] sm:$0xff]  ;;  %s110_s16 = smov 32   ;;  %vm31_vm0 = vcmask 261120   ;;  %s111_s17 = smov [#allocation5]  }
   0x6   :  { %28 = vrot.lane.b32.xlu0 %v26_v0, %s110_s16  ;;  %v33_v1 = vld [vmem:[#allocation2] sm:$0xff]  ;;  %s42_s18 = sshll.u32 %s111_s17, 4  ;;  %s44_s0 = sshll.u32 %s138_s2, 4  ;;  %vm35_vm1 = vcmask 523264   ;;  %s43_s18 = int_to_ptr.vmem [resolvable:$true] %s42_s18  ;;  %s45_s0 = int_to_ptr.hbm [resolvable:$true] %s44_s0 }
  0x78   :  { %v29_v2 = vpop.permute.xlu0 %28 }
  0x79   :  { %v32_v3 = vsel %vm31_vm0, %v26_v0, %v29_v2 }
  0x7a   :  { %v34_v4 = vadd.f32 %v33_v1, %v32_v3 }
  0x7c   :  { %36 = vst.msk [vmem:[#allocation5] sm:$0xff] %vm35_vm1, %v34_v4 }
  0x7d   :  { %47 = dma.vmem_to_hbm [thread:$0]  %s43_s18, 128, %s45_s0, [#allocation4]  }
  0x7e   :  { %107 = dma.done.wait [#allocation4], 128  }
  0x7f   :  { %108 = vsyncadd [#allocation4], 4294967168 }
  0x80   :  { %52 = vsyncpa [#allocation3], 1 }
  0x81   :  { %53 = vsyncpa [#allocation4], 1 }

</bundles_post_ra>
